<compile_context>
chip_gen: v7x
topology: tpu7x:2x2x1
jax: 0.10.0
libtpu: 0.0.40
codegen_flags: <defaults>
</compile_context>

<pallas_src>
import functools
import math

import jax
import jax.numpy as jnp
from jax.experimental import pallas as pl
from jax.experimental.pallas import tpu as pltpu

_LANE = 128     # lane width of a vreg
_SUBLANE = 8    # sublane count of a vreg


def _round_up(x, m):
    return ((x + m - 1) // m) * m


def _leaky_relu(x, negative_slope=0.01):
    # nn.LeakyReLU() default negative_slope = 0.01
    return jnp.where(x > 0, x, negative_slope * x)


def _tpu_caps():
    """Best-effort query of per-TensorCore VMEM capacity and TC count."""
    vmem_cap = 128 << 20          # v5e / v6e default
    num_tc = 1
    try:
        info = pltpu.get_tpu_info()
        vmem_cap = int(getattr(info, "vmem_capacity_bytes", vmem_cap))
    except Exception:
        pass
    try:
        if "v7" in jax.devices()[0].device_kind.lower():
            num_tc = 2
    except Exception:
        pass
    # v7x exposes ~64 MiB VMEM per TC and has 2 TCs per chip.
    if vmem_cap <= (64 << 20) + (1 << 20):
        num_tc = max(num_tc, 2)
    return vmem_cap, num_tc


def _mlp_kernel(num_layers, compute_dtype, x_ref, *refs):
    """Fused MLP forward on one batch tile.

    refs = (W0, b0, W1, b1, ..., W_{L-1}, b_{L-1}, out)
      Wi : (in_pad, out_pad)  -- pre-transposed + zero padded, compute_dtype
      bi : (1, out_pad)       -- zero padded, f32
    Hidden layers: LeakyReLU(0.01).  Final layer: Tanh.
    Matmuls run on the MXU with f32 accumulation; activations on the VPU in f32.
    """
    out_ref = refs[-1]
    param_refs = refs[:-1]

    z = x_ref[...]
    for layer in range(num_layers):
        w = param_refs[2 * layer][...]           # (in_pad, out_pad)
        b = param_refs[2 * layer + 1][...]       # (1, out_pad)
        z = jnp.dot(z.astype(compute_dtype), w.astype(compute_dtype),
                    preferred_element_type=jnp.float32)
        z = z + b.astype(jnp.float32)
        if layer < num_layers - 1:
            z = _leaky_relu(z)
        else:
            z = jnp.tanh(z)
    out_ref[...] = z.astype(out_ref.dtype)


def policy_forward(observation, weights, biases, *, block_batch=512,
                   compute_dtype=jnp.float32):
    """Run the fused MLP Pallas kernel.

    observation : (batch, i_size) float32
    weights     : list of (out_f, in_f) float32 arrays (PyTorch nn.Linear layout)
    biases      : list of (out_f,) float32 arrays
    compute_dtype: dtype fed to the MXU.  f32 (default) is exact; bf16 halves
        input/weight DMA bytes and uses the bf16-native MXUs on v6e/v7x (note:
        it quantizes the stored parameters too).  On v5e the bf16 win is only
        DMA bytes, so f32 is the sensible default there as well.  Accumulation
        and all elementwise activations stay f32 on every generation.
    """
    num_layers = len(weights)
    batch, i_size = observation.shape
    o_size = weights[-1].shape[0]

    # ---- trace-time layout prep (outside the kernel) ------------------------
    sizes = [i_size] + [w.shape[0] for w in weights]          # layer widths
    padded = [_round_up(s, _LANE) for s in sizes]             # lane-dense widths
    in_p0, out_p = padded[0], padded[-1]

    packed_params = []
    for layer, (w, b) in enumerate(zip(weights, biases)):
        in_p, op = padded[layer], padded[layer + 1]
        # Pre-transpose to (in_f, out_f) and zero-pad to (in_p, op).
        wt = jnp.zeros((in_p, op), compute_dtype)
        wt = wt.at[: w.shape[1], : w.shape[0]].set(w.T.astype(compute_dtype))
        bp = jnp.zeros((1, op), jnp.float32)
        bp = bp.at[0, : b.shape[0]].set(b.astype(jnp.float32))
        packed_params.append(wt)
        packed_params.append(bp)

    # Observation: pad ONLY the feature axis (no extra HBM write+read of a
    # batch-padded copy).  Stored in compute_dtype so bf16 halves the tile DMA.
    obs_f = observation.astype(compute_dtype)
    if in_p0 != i_size:
        obs_f = jnp.pad(obs_f, ((0, 0), (0, in_p0 - i_size)))

    vmem_cap, num_tc = _tpu_caps()
    in_itemsize = jnp.dtype(compute_dtype).itemsize
    param_bytes = sum(int(a.size) * a.dtype.itemsize for a in packed_params)

    # ---- batch tile ---------------------------------------------------------
    tm = min(block_batch, _round_up(batch, _SUBLANE))
    tm = max(_SUBLANE, (tm // _SUBLANE) * _SUBLANE)   # enforce (8,128) rule
    # Fit tm under a conservative VMEM budget (params are single-buffered).
    per_row = (2 * in_p0 * in_itemsize        # double-buffered input tile
               + 2 * out_p * 4                # double-buffered output tile
               + 4 * max(padded) * 4)         # f32 intermediates headroom
    budget = int(0.6 * vmem_cap) - param_bytes
    if budget > per_row * _SUBLANE:
        tm_vmem = (budget // per_row) // _SUBLANE * _SUBLANE
        tm = min(tm, max(_SUBLANE, tm_vmem))
    # Keep >= num_tc grid steps so the "parallel" batch axis can actually be
    # split across v7x's two TensorCores (no-op on 1-TC v5e/v6e).
    if num_tc > 1 and batch > _SUBLANE:
        per_core = _round_up(pl.cdiv(batch, num_tc), _SUBLANE)
        tm = min(tm, per_core)
    grid = (pl.cdiv(batch, tm),)

    # ---- VMEM limit: generation-aware, with headroom ------------------------
    act_bytes = tm * in_p0 * in_itemsize * 2 + tm * out_p * 4 * 2
    inter_bytes = 6 * tm * max(padded) * 4
    est = param_bytes + act_bytes + inter_bytes + (4 << 20)
    cap = int(0.8 * vmem_cap)     # ~51 MiB on v7x, ~102 MiB on v5e/v6e
    vmem_limit = int(min(max(est, 16 << 20), cap))

    def _batch_map(i):            # activation / output tiles march over batch
        return (i, 0)

    def _const_map(i):            # weights & biases: same block every step
        return (0, 0)

    kernel = functools.partial(_mlp_kernel, num_layers, compute_dtype)

    def _make_call(single_buffer_params):
        in_specs = [pl.BlockSpec((tm, in_p0), _batch_map)]
        for arr in packed_params:
            if single_buffer_params:
                # Constant index_map => the block never changes; single
                # buffering halves the params' VMEM footprint.
                spec = pl.BlockSpec(tuple(arr.shape), _const_map,
                                    pipeline_mode=pl.Buffered(1))
            else:
                spec = pl.BlockSpec(tuple(arr.shape), _const_map)
            in_specs.append(spec)
        return pl.pallas_call(
            kernel,
            out_shape=jax.ShapeDtypeStruct((batch, out_p), jnp.float32),
            grid=grid,
            in_specs=in_specs,
            out_specs=pl.BlockSpec((tm, out_p), _batch_map),
            compiler_params=pltpu.CompilerParams(
                dimension_semantics=("parallel",),
                vmem_limit_bytes=vmem_limit,
            ),
        )

    try:
        out_padded = jax.block_until_ready(
            _make_call(True)(obs_f, *packed_params))
    except Exception:
        # Fallback for environments where pipeline_mode=pl.Buffered(1) is not
        # accepted by the top-level TPU pallas_call pipeline.
        out_padded = _make_call(False)(obs_f, *packed_params)

    # TODO(synk): if single-buffered param bytes ever exceed ~40 MiB (very wide
    # hidden layers on v7x's 64 MiB VMEM), stream weight tiles from HBM with an
    # inner pltpu.emit_pipeline instead of keeping full weights resident.
    return out_padded[:, :o_size]


def init_params(key, i_size, hidden_sizes, o_size):
    """Deterministic init matching the PyTorch module's __init__."""
    sizes = [i_size] + list(hidden_sizes) + [o_size]
    weights, biases = [], []
    n_layers = len(sizes) - 1
    for layer in range(n_layers):
        in_f, out_f = sizes[layer], sizes[layer + 1]
        key, wk, bk = jax.random.split(key, 3)
        if layer < n_layers - 1:
            bound = 1.0 / math.sqrt(in_f)
            w = jax.random.uniform(wk, (out_f, in_f), jnp.float32, -bound, bound)
            b = jnp.zeros((out_f,), jnp.float32)
        else:
            w = jax.random.uniform(wk, (out_f, in_f), jnp.float32, -0.003, 0.003)
            b = jax.random.uniform(bk, (out_f,), jnp.float32, -0.003, 0.003)
        weights.append(w)
        biases.append(b)
    return weights, biases


def reference_forward(observation, weights, biases):
    """Pure-JAX reference (exact nn.Linear / LeakyReLU / Tanh semantics)."""
    z = observation
    n = len(weights)
    for i, (w, b) in enumerate(zip(weights, biases)):
        z = z @ w.T + b
        z = _leaky_relu(z) if i < n - 1 else jnp.tanh(z)
    return z


if __name__ == "__main__":
    key = jax.random.PRNGKey(0)

    # Small shapes consistent with the module: obs (batch, i_size).
    batch, i_size, hidden_sizes, o_size = 8, 32, [32, 32], 8

    key, pkey, xkey = jax.random.split(key, 3)
    weights, biases = init_params(pkey, i_size, hidden_sizes, o_size)
    observation = jax.random.normal(xkey, (batch, i_size), jnp.float32)

    ref = reference_forward(observation, weights, biases)

    # f32 matmul path (exact vs reference).
    out = jax.block_until_ready(policy_forward(observation, weights, biases))
    assert out.shape == (batch, o_size)
    assert jnp.allclose(out, ref, atol=1e-5, rtol=1e-5), "f32 mismatch vs reference"

    # bf16-matmul / f32-accumulate path (v6e/v7x MXU-native), looser tolerance
    # (weights + observation are quantized to bf16 in this mode).
    out_bf16 = jax.block_until_ready(
        policy_forward(observation, weights, biases, compute_dtype=jnp.bfloat16))
    assert out_bf16.shape == (batch, o_size)
    assert jnp.allclose(out_bf16, ref, atol=3e-2, rtol=3e-2), "bf16 mismatch vs reference"

    # Exercise a non-8-aligned batch and block_batch to check the ragged-tile
    # path (no batch padding in HBM) and the tm rounding.
    key, xkey2 = jax.random.split(key)
    obs2 = jax.random.normal(xkey2, (13, i_size), jnp.float32)
    out2 = jax.block_until_ready(
        policy_forward(obs2, weights, biases, block_batch=100))
    ref2 = reference_forward(obs2, weights, biases)
    assert out2.shape == (13, o_size)
    assert jnp.allclose(out2, ref2, atol=1e-5, rtol=1e-5), "ragged-batch mismatch"

    print("KERNEL_OK")
</pallas_src>

<mosaic_0001>
module attributes {stable_mosaic.version = 11 : i64} {
  func.func @_mlp_kernel(%arg0: i32, %arg1: memref<8x128xf32, #tpu.memory_space<vmem>>, %arg2: memref<128x128xf32, #tpu.memory_space<vmem>>, %arg3: memref<1x128xf32, #tpu.memory_space<vmem>>, %arg4: memref<128x128xf32, #tpu.memory_space<vmem>>, %arg5: memref<1x128xf32, #tpu.memory_space<vmem>>, %arg6: memref<128x128xf32, #tpu.memory_space<vmem>>, %arg7: memref<1x128xf32, #tpu.memory_space<vmem>>, %arg8: memref<8x128xf32, #tpu.memory_space<vmem>>) attributes {dimension_semantics = [#tpu.dimension_semantics<parallel>], iteration_bounds = array<i64: 1>, scalar_prefetch = 0 : i64, scratch_operands = 0 : i64, tpu.core_type = #tpu.core_type<tc>, window_params = [{transform_indices = @transform_0, window_bounds = array<i64: 8, 128>}, {pipeline_mode = #tpu.pipeline_mode<synchronous>, transform_indices = @transform_1, window_bounds = array<i64: 128, 128>}, {pipeline_mode = #tpu.pipeline_mode<synchronous>, transform_indices = @transform_2, window_bounds = array<i64: 1, 128>}, {pipeline_mode = #tpu.pipeline_mode<synchronous>, transform_indices = @transform_3, window_bounds = array<i64: 128, 128>}, {pipeline_mode = #tpu.pipeline_mode<synchronous>, transform_indices = @transform_4, window_bounds = array<i64: 1, 128>}, {pipeline_mode = #tpu.pipeline_mode<synchronous>, transform_indices = @transform_5, window_bounds = array<i64: 128, 128>}, {pipeline_mode = #tpu.pipeline_mode<synchronous>, transform_indices = @transform_6, window_bounds = array<i64: 1, 128>}, {transform_indices = @transform_7, window_bounds = array<i64: 8, 128>}]} {
    %c0 = arith.constant 0 : index
    %c0_0 = arith.constant 0 : index
    %0 = vector.load %arg1[%c0, %c0_0] : memref<8x128xf32, #tpu.memory_space<vmem>>, vector<8x128xf32>
    %c0_1 = arith.constant 0 : index
    %c0_2 = arith.constant 0 : index
    %1 = vector.load %arg2[%c0_1, %c0_2] : memref<128x128xf32, #tpu.memory_space<vmem>>, vector<128x128xf32>
    %c0_3 = arith.constant 0 : index
    %c0_4 = arith.constant 0 : index
    %2 = vector.load %arg3[%c0_3, %c0_4] : memref<1x128xf32, #tpu.memory_space<vmem>>, vector<1x128xf32>
    %cst = arith.constant dense<0.000000e+00> : vector<8x128xf32>
    %3 = tpu.matmul %0, %1, %cst {dimension_numbers = #tpu.dot_dimension_numbers<[1], [0], [0], [1], [0, 0, 1, 1], [], []>} : vector<8x128xf32>, vector<128x128xf32>, vector<8x128xf32> -> vector<8x128xf32>
    %4 = vector.broadcast %2 : vector<1x128xf32> to vector<8x128xf32>
    %5 = arith.addf %3, %4 : vector<8x128xf32>
    %cst_5 = arith.constant 0.000000e+00 : f32
    %6 = vector.broadcast %cst_5 : f32 to vector<8x128xf32>
    %7 = arith.cmpf ogt, %5, %6 : vector<8x128xf32>
    %cst_6 = arith.constant 0.00999999977 : f32
    %8 = vector.broadcast %cst_6 : f32 to vector<8x128xf32>
    %9 = arith.mulf %8, %5 : vector<8x128xf32>
    %10 = arith.select %7, %5, %9 : vector<8x128xi1>, vector<8x128xf32>
    %c0_7 = arith.constant 0 : index
    %c0_8 = arith.constant 0 : index
    %11 = vector.load %arg4[%c0_7, %c0_8] : memref<128x128xf32, #tpu.memory_space<vmem>>, vector<128x128xf32>
    %c0_9 = arith.constant 0 : index
    %c0_10 = arith.constant 0 : index
    %12 = vector.load %arg5[%c0_9, %c0_10] : memref<1x128xf32, #tpu.memory_space<vmem>>, vector<1x128xf32>
    %cst_11 = arith.constant dense<0.000000e+00> : vector<8x128xf32>
    %13 = tpu.matmul %10, %11, %cst_11 {dimension_numbers = #tpu.dot_dimension_numbers<[1], [0], [0], [1], [0, 0, 1, 1], [], []>} : vector<8x128xf32>, vector<128x128xf32>, vector<8x128xf32> -> vector<8x128xf32>
    %14 = vector.broadcast %12 : vector<1x128xf32> to vector<8x128xf32>
    %15 = arith.addf %13, %14 : vector<8x128xf32>
    %cst_12 = arith.constant 0.000000e+00 : f32
    %16 = vector.broadcast %cst_12 : f32 to vector<8x128xf32>
    %17 = arith.cmpf ogt, %15, %16 : vector<8x128xf32>
    %cst_13 = arith.constant 0.00999999977 : f32
    %18 = vector.broadcast %cst_13 : f32 to vector<8x128xf32>
    %19 = arith.mulf %18, %15 : vector<8x128xf32>
    %20 = arith.select %17, %15, %19 : vector<8x128xi1>, vector<8x128xf32>
    %c0_14 = arith.constant 0 : index
    %c0_15 = arith.constant 0 : index
    %21 = vector.load %arg6[%c0_14, %c0_15] : memref<128x128xf32, #tpu.memory_space<vmem>>, vector<128x128xf32>
    %c0_16 = arith.constant 0 : index
    %c0_17 = arith.constant 0 : index
    %22 = vector.load %arg7[%c0_16, %c0_17] : memref<1x128xf32, #tpu.memory_space<vmem>>, vector<1x128xf32>
    %cst_18 = arith.constant dense<0.000000e+00> : vector<8x128xf32>
    %23 = tpu.matmul %20, %21, %cst_18 {dimension_numbers = #tpu.dot_dimension_numbers<[1], [0], [0], [1], [0, 0, 1, 1], [], []>} : vector<8x128xf32>, vector<128x128xf32>, vector<8x128xf32> -> vector<8x128xf32>
    %24 = vector.broadcast %22 : vector<1x128xf32> to vector<8x128xf32>
    %25 = arith.addf %23, %24 : vector<8x128xf32>
    %26 = math.tanh %25 : vector<8x128xf32>
    %c0_19 = arith.constant 0 : index
    %c0_20 = arith.constant 0 : index
    %27 = vector.load %arg8[%c0_19, %c0_20] : memref<8x128xf32, #tpu.memory_space<vmem>>, vector<8x128xf32>
    tpu.vector_store %arg8[%c0_19, %c0_20], %26 {strides = array<i32>} : memref<8x128xf32, #tpu.memory_space<vmem>>, vector<8x128xf32>,
    return
  }
  func.func @transform_0(%arg0: i32) -> (i32, i32) {
    %c0_i32 = arith.constant 0 : i32
    %c0_i32_0 = arith.constant 0 : i32
    return %arg0, %c0_i32 : i32, i32
  }
  func.func @transform_1(%arg0: i32) -> (i32, i32) {
    %c0_i32 = arith.constant 0 : i32
    %c0_i32_0 = arith.constant 0 : i32
    %c0_i32_1 = arith.constant 0 : i32
    return %c0_i32, %c0_i32_0 : i32, i32
  }
  func.func @transform_2(%arg0: i32) -> (i32, i32) {
    %c0_i32 = arith.constant 0 : i32
    %c0_i32_0 = arith.constant 0 : i32
    %c0_i32_1 = arith.constant 0 : i32
    return %c0_i32, %c0_i32_0 : i32, i32
  }
  func.func @transform_3(%arg0: i32) -> (i32, i32) {
    %c0_i32 = arith.constant 0 : i32
    %c0_i32_0 = arith.constant 0 : i32
    %c0_i32_1 = arith.constant 0 : i32
    return %c0_i32, %c0_i32_0 : i32, i32
  }
  func.func @transform_4(%arg0: i32) -> (i32, i32) {
    %c0_i32 = arith.constant 0 : i32
    %c0_i32_0 = arith.constant 0 : i32
    %c0_i32_1 = arith.constant 0 : i32
    return %c0_i32, %c0_i32_0 : i32, i32
  }
  func.func @transform_5(%arg0: i32) -> (i32, i32) {
    %c0_i32 = arith.constant 0 : i32
    %c0_i32_0 = arith.constant 0 : i32
    %c0_i32_1 = arith.constant 0 : i32
    return %c0_i32, %c0_i32_0 : i32, i32
  }
  func.func @transform_6(%arg0: i32) -> (i32, i32) {
    %c0_i32 = arith.constant 0 : i32
    %c0_i32_0 = arith.constant 0 : i32
    %c0_i32_1 = arith.constant 0 : i32
    return %c0_i32, %c0_i32_0 : i32, i32
  }
  func.func @transform_7(%arg0: i32) -> (i32, i32) {
    %c0_i32 = arith.constant 0 : i32
    %c0_i32_0 = arith.constant 0 : i32
    return %arg0, %c0_i32 : i32, i32
  }
}

module attributes {stable_mosaic.version = 11 : i64} {
  func.func @_mlp_kernel(%arg0: i32, %arg1: memref<8x128xf32, #tpu.memory_space<vmem>>, %arg2: memref<128x128xf32, #tpu.memory_space<vmem>>, %arg3: memref<1x128xf32, #tpu.memory_space<vmem>>, %arg4: memref<128x128xf32, #tpu.memory_space<vmem>>, %arg5: memref<1x128xf32, #tpu.memory_space<vmem>>, %arg6: memref<128x128xf32, #tpu.memory_space<vmem>>, %arg7: memref<1x128xf32, #tpu.memory_space<vmem>>, %arg8: memref<8x128xf32, #tpu.memory_space<vmem>>) attributes {dimension_semantics = [#tpu.dimension_semantics<parallel>], iteration_bounds = array<i64: 1>, scalar_prefetch = 0 : i64, scratch_operands = 0 : i64, tpu.core_type = #tpu.core_type<tc>, window_params = [{transform_indices = @transform_0, window_bounds = array<i64: 8, 128>}, {pipeline_mode = #tpu.pipeline_mode<synchronous>, transform_indices = @transform_1, window_bounds = array<i64: 128, 128>}, {pipeline_mode = #tpu.pipeline_mode<synchronous>, transform_indices = @transform_2, window_bounds = array<i64: 1, 128>}, {pipeline_mode = #tpu.pipeline_mode<synchronous>, transform_indices = @transform_3, window_bounds = array<i64: 128, 128>}, {pipeline_mode = #tpu.pipeline_mode<synchronous>, transform_indices = @transform_4, window_bounds = array<i64: 1, 128>}, {pipeline_mode = #tpu.pipeline_mode<synchronous>, transform_indices = @transform_5, window_bounds = array<i64: 128, 128>}, {pipeline_mode = #tpu.pipeline_mode<synchronous>, transform_indices = @transform_6, window_bounds = array<i64: 1, 128>}, {transform_indices = @transform_7, window_bounds = array<i64: 8, 128>}]} {
    %c0 = arith.constant 0 : index
    %c0_0 = arith.constant 0 : index
    %0 = vector.load %arg1[%c0, %c0_0] : memref<8x128xf32, #tpu.memory_space<vmem>>, vector<8x128xf32>
    %c0_1 = arith.constant 0 : index
    %c0_2 = arith.constant 0 : index
    %1 = vector.load %arg2[%c0_1, %c0_2] : memref<128x128xf32, #tpu.memory_space<vmem>>, vector<128x128xf32>
    %c0_3 = arith.constant 0 : index
    %c0_4 = arith.constant 0 : index
    %2 = vector.load %arg3[%c0_3, %c0_4] : memref<1x128xf32, #tpu.memory_space<vmem>>, vector<1x128xf32>
    %cst = arith.constant dense<0.000000e+00> : vector<8x128xf32>
    %3 = tpu.matmul %0, %1, %cst {dimension_numbers = #tpu.dot_dimension_numbers<[1], [0], [0], [1], [0, 0, 1, 1], [], []>} : vector<8x128xf32>, vector<128x128xf32>, vector<8x128xf32> -> vector<8x128xf32>
    %4 = vector.broadcast %2 : vector<1x128xf32> to vector<8x128xf32>
    %5 = arith.addf %3, %4 : vector<8x128xf32>
    %cst_5 = arith.constant 0.000000e+00 : f32
    %6 = vector.broadcast %cst_5 : f32 to vector<8x128xf32>
    %7 = arith.cmpf ogt, %5, %6 : vector<8x128xf32>
    %cst_6 = arith.constant 0.00999999977 : f32
    %8 = vector.broadcast %cst_6 : f32 to vector<8x128xf32>
    %9 = arith.mulf %8, %5 : vector<8x128xf32>
    %10 = arith.select %7, %5, %9 : vector<8x128xi1>, vector<8x128xf32>
    %c0_7 = arith.constant 0 : index
    %c0_8 = arith.constant 0 : index
    %11 = vector.load %arg4[%c0_7, %c0_8] : memref<128x128xf32, #tpu.memory_space<vmem>>, vector<128x128xf32>
    %c0_9 = arith.constant 0 : index
    %c0_10 = arith.constant 0 : index
    %12 = vector.load %arg5[%c0_9, %c0_10] : memref<1x128xf32, #tpu.memory_space<vmem>>, vector<1x128xf32>
    %cst_11 = arith.constant dense<0.000000e+00> : vector<8x128xf32>
    %13 = tpu.matmul %10, %11, %cst_11 {dimension_numbers = #tpu.dot_dimension_numbers<[1], [0], [0], [1], [0, 0, 1, 1], [], []>} : vector<8x128xf32>, vector<128x128xf32>, vector<8x128xf32> -> vector<8x128xf32>
    %14 = vector.broadcast %12 : vector<1x128xf32> to vector<8x128xf32>
    %15 = arith.addf %13, %14 : vector<8x128xf32>
    %cst_12 = arith.constant 0.000000e+00 : f32
    %16 = vector.broadcast %cst_12 : f32 to vector<8x128xf32>
    %17 = arith.cmpf ogt, %15, %16 : vector<8x128xf32>
    %cst_13 = arith.constant 0.00999999977 : f32
    %18 = vector.broadcast %cst_13 : f32 to vector<8x128xf32>
    %19 = arith.mulf %18, %15 : vector<8x128xf32>
    %20 = arith.select %17, %15, %19 : vector<8x128xi1>, vector<8x128xf32>
    %c0_14 = arith.constant 0 : index
    %c0_15 = arith.constant 0 : index
    %21 = vector.load %arg6[%c0_14, %c0_15] : memref<128x128xf32, #tpu.memory_space<vmem>>, vector<128x128xf32>
    %c0_16 = arith.constant 0 : index
    %c0_17 = arith.constant 0 : index
    %22 = vector.load %arg7[%c0_16, %c0_17] : memref<1x128xf32, #tpu.memory_space<vmem>>, vector<1x128xf32>
    %cst_18 = arith.constant dense<0.000000e+00> : vector<8x128xf32>
    %23 = tpu.matmul %20, %21, %cst_18 {dimension_numbers = #tpu.dot_dimension_numbers<[1], [0], [0], [1], [0, 0, 1, 1], [], []>} : vector<8x128xf32>, vector<128x128xf32>, vector<8x128xf32> -> vector<8x128xf32>
    %24 = vector.broadcast %22 : vector<1x128xf32> to vector<8x128xf32>
    %25 = arith.addf %23, %24 : vector<8x128xf32>
    %26 = math.tanh %25 : vector<8x128xf32>
    %c0_19 = arith.constant 0 : index
    %c0_20 = arith.constant 0 : index
    %27 = vector.load %arg8[%c0_19, %c0_20] : memref<8x128xf32, #tpu.memory_space<vmem>>, vector<8x128xf32>
    tpu.vector_store %arg8[%c0_19, %c0_20], %26 {strides = array<i32>} : memref<8x128xf32, #tpu.memory_space<vmem>>, vector<8x128xf32>,
    return
  }
  func.func @transform_0(%arg0: i32) -> (i32, i32) {
    %c0_i32 = arith.constant 0 : i32
    %c0_i32_0 = arith.constant 0 : i32
    return %arg0, %c0_i32 : i32, i32
  }
  func.func @transform_1(%arg0: i32) -> (i32, i32) {
    %c0_i32 = arith.constant 0 : i32
    %c0_i32_0 = arith.constant 0 : i32
    %c0_i32_1 = arith.constant 0 : i32
    return %c0_i32, %c0_i32_0 : i32, i32
  }
  func.func @transform_2(%arg0: i32) -> (i32, i32) {
    %c0_i32 = arith.constant 0 : i32
    %c0_i32_0 = arith.constant 0 : i32
    %c0_i32_1 = arith.constant 0 : i32
    return %c0_i32, %c0_i32_0 : i32, i32
  }
  func.func @transform_3(%arg0: i32) -> (i32, i32) {
    %c0_i32 = arith.constant 0 : i32
    %c0_i32_0 = arith.constant 0 : i32
    %c0_i32_1 = arith.constant 0 : i32
    return %c0_i32, %c0_i32_0 : i32, i32
  }
  func.func @transform_4(%arg0: i32) -> (i32, i32) {
    %c0_i32 = arith.constant 0 : i32
    %c0_i32_0 = arith.constant 0 : i32
    %c0_i32_1 = arith.constant 0 : i32
    return %c0_i32, %c0_i32_0 : i32, i32
  }
  func.func @transform_5(%arg0: i32) -> (i32, i32) {
    %c0_i32 = arith.constant 0 : i32
    %c0_i32_0 = arith.constant 0 : i32
    %c0_i32_1 = arith.constant 0 : i32
    return %c0_i32, %c0_i32_0 : i32, i32
  }
  func.func @transform_6(%arg0: i32) -> (i32, i32) {
    %c0_i32 = arith.constant 0 : i32
    %c0_i32_0 = arith.constant 0 : i32
    %c0_i32_1 = arith.constant 0 : i32
    return %c0_i32, %c0_i32_0 : i32, i32
  }
  func.func @transform_7(%arg0: i32) -> (i32, i32) {
    %c0_i32 = arith.constant 0 : i32
    %c0_i32_0 = arith.constant 0 : i32
    return %arg0, %c0_i32 : i32, i32
  }
}

</mosaic_0001>

<bundles_post_ra>
// kernel: tpu_custom_call.1
= control target key start
LH: loop header
LB: loop body
LE: loop exit
PB: predicated region body
PF: predicated region fallthrough
CT: control target
= control target key end

     0   :  { %12 = vsyncpa [#allocation3], 0  ;;  %s904_s0 = inlined_call_operand.hbm [shape: f32[8,128], index: 0, kind: input, shape index: {}]   ;;  %s905_s1 = inlined_call_operand.hbm [shape: f32[128,128], index: 1, kind: input, shape index: {}]   ;;  %s906_s2 = inlined_call_operand.vmem [shape: f32[1,128], index: 2, kind: input, shape index: {}]   ;;  %s907_s3 = inlined_call_operand.hbm [shape: f32[128,128], index: 3, kind: input, shape index: {}]   ;;  %s908_s4 = inlined_call_operand.vmem [shape: f32[1,128], index: 4, kind: input, shape index: {}]   ;;  %s909_s5 = inlined_call_operand.hbm [shape: f32[128,128], index: 5, kind: input, shape index: {}]   ;;  %s910_s6 = inlined_call_operand.vmem [shape: f32[1,128], index: 6, kind: input, shape index: {}]   ;;  %s911_s7 = inlined_call_operand.hbm [shape: f32[8,128], index: 7, kind: output, shape index: {}]  }
   0x1   :  { %13 = vsyncpa [#allocation6], 0 }
   0x2   :  { %14 = vsyncpa [#allocation9], 0 }
   0x3   :  { %15 = vsyncpa [#allocation4], 0  ;;  %s746_s24 = smov [#allocation5]   ;;  %s628_s28 = scalar_lea.hbm %s905_s1, 2048 }
   0x4   :  { %s31_s25 = sshll.u32 %s746_s24, 4  ;;  %p629_p0 = scmp.ne.s32.totalorder %s905_s1, %s628_s28  ;;  %s32_s25 = int_to_ptr.vmem [resolvable:$true] %s31_s25 }
   0x5   :  { %p632_p1 = scmp.lt.u32.totalorder %s628_s28, %s905_s1 }
   0x7   :  { %p634_p2 = pnand %p632_p1, %p629_p0 }
   0x9   :  { %637 = shalt.err (!%p634_p2)
}
   0xa   :  { %s638_s10 = scalar_lea.vmem %s32_s25, 2048  ;;  %p643_p4 = scmp.lt.s32.totalorder %s32_s25, %s32_s25 }
   0xb   :  { %p639_p3 = scmp.ne.s32.totalorder %s32_s25, %s638_s10  ;;  %p644_p5 = scmp.lt.s32.totalorder %s638_s10, %s638_s10 }
   0xd   :  { %p645_p6 = por %p644_p5, %p643_p4 }
   0xf   :  { %p646_p7 = pnand %p645_p6, %p639_p3 }
  0x11   :  { %649 = shalt.err (!%p646_p7)
}
  0x12   :  { %s747_s11 = smov 128   ;;  %s748_s12 = smov 8  }
  0x13   :  { %37 = dma.hbm_to_vmem [thread:$0]  %s905_s1, 2048, %s32_s25, [#allocation6], %s747_s11, %s747_s11, %s748_s12  }
  0x14   :  { %s749_s15 = smov [#allocation2]   ;;  %s750_s17 = smov [#allocation7]  }
  0x15   :  { %s22_s16 = sshll.u32 %s749_s15, 4  ;;  %s45_s18 = sshll.u32 %s750_s17, 4  ;;  %s23_s16 = int_to_ptr.vmem [resolvable:$true] %s22_s16  ;;  %s46_s18 = int_to_ptr.vmem [resolvable:$true] %s45_s18 }
  0x16   :  { %s650_s21 = scalar_lea.hbm %s904_s0, 128 }
  0x17   :  { %p651_p8 = scmp.ne.s32.totalorder %s904_s0, %s650_s21  ;;  %p654_p9 = scmp.lt.u32.totalorder %s650_s21, %s904_s0 }
  0x19   :  { %p656_p10 = pnand %p654_p9, %p651_p8 }
  0x1b   :  { %659 = shalt.err (!%p656_p10)
}
  0x1c   :  { %s660_s1 = scalar_lea.vmem %s23_s16, 128  ;;  %p665_p12 = scmp.lt.s32.totalorder %s23_s16, %s23_s16 }
  0x1d   :  { %p661_p11 = scmp.ne.s32.totalorder %s23_s16, %s660_s1  ;;  %p666_p13 = scmp.lt.s32.totalorder %s660_s1, %s660_s1 }
  0x1f   :  { %p667_p0 = por %p666_p13, %p665_p12 }
  0x21   :  { %p668_p1 = pnand %p667_p0, %p661_p11 }
  0x23   :  { %671 = shalt.err (!%p668_p1)
}
  0x24   :  { %25 = dma.hbm_to_vmem [thread:$0]  %s904_s0, 128, %s23_s16, [#allocation3]  }
  0x25   :  { %s672_s30 = scalar_lea.hbm %s907_s3, 2048 }
  0x26   :  { %p673_p2 = scmp.ne.s32.totalorder %s907_s3, %s672_s30  ;;  %p676_p3 = scmp.lt.u32.totalorder %s672_s30, %s907_s3 }
  0x28   :  { %p678_p4 = pnand %p676_p3, %p673_p2 }
  0x2a   :  { %681 = shalt.err (!%p678_p4)
}
  0x2b   :  { %s682_s14 = scalar_lea.vmem %s46_s18, 2048  ;;  %p687_p6 = scmp.lt.s32.totalorder %s46_s18, %s46_s18 }
  0x2c   :  { %p683_p5 = scmp.ne.s32.totalorder %s46_s18, %s682_s14  ;;  %p688_p7 = scmp.lt.s32.totalorder %s682_s14, %s682_s14 }
  0x2e   :  { %p689_p8 = por %p688_p7, %p687_p6 }
  0x30   :  { %p690_p9 = pnand %p689_p8, %p683_p5 }
  0x32   :  { %693 = shalt.err (!%p690_p9)
}
  0x33   :  { %51 = dma.hbm_to_vmem [thread:$0]  %s907_s3, 2048, %s46_s18, [#allocation6], %s747_s11, %s747_s11, %s748_s12  }
  0x34   :  { %s751_s16 = smov [#allocation8]   ;;  %s694_s21 = scalar_lea.hbm %s909_s5, 2048 }
  0x35   :  { %s59_s17 = sshll.u32 %s751_s16, 4  ;;  %p695_p10 = scmp.ne.s32.totalorder %s909_s5, %s694_s21  ;;  %s60_s17 = int_to_ptr.vmem [resolvable:$true] %s59_s17 }
  0x36   :  { %p698_p11 = scmp.lt.u32.totalorder %s694_s21, %s909_s5 }
  0x38   :  { %p700_p12 = pnand %p698_p11, %p695_p10 }
  0x3a   :  { %703 = shalt.err (!%p700_p12)
}
  0x3b   :  { %s704_s1 = scalar_lea.vmem %s60_s17, 2048  ;;  %p709_p0 = scmp.lt.s32.totalorder %s60_s17, %s60_s17 }
  0x3c   :  { %p705_p13 = scmp.ne.s32.totalorder %s60_s17, %s704_s1  ;;  %p710_p1 = scmp.lt.s32.totalorder %s704_s1, %s704_s1 }
  0x3e   :  { %p711_p2 = por %p710_p1, %p709_p0 }
  0x40   :  { %p712_p3 = pnand %p711_p2, %p705_p13 }
  0x42   :  { %715 = shalt.err (!%p712_p3)
}
  0x43   :  { %65 = dma.hbm_to_vmem [thread:$0]  %s909_s5, 2048, %s60_s17, [#allocation9], %s747_s11, %s747_s11, %s748_s12  }
  0x44   :  { %738 = dma.done.wait [#allocation3], 128  }
  0x45   :  { %739 = vsyncadd [#allocation3], 4294967168 }
  0x46   :  { %740 = dma.done.wait [#allocation6], 4096  }
  0x47   :  { %741 = vsyncadd [#allocation6], 4294963200 }
  0x48   :  { %742 = dma.done.wait [#allocation9], 2048  }
  0x49   :  { %743 = vsyncadd [#allocation9], 4294965248  ;;  %v752_v0 = vmov 0.0|0.0   ;;  %vm753_vm0 = vmmov 0   ;;  %v754_v1 = vmov 0.0   ;;  %v81_v2 = vld [vmem:[#allocation5] sm:$0xff] }
  0x4a   :  { %544 = vmatprep.subr.bf16.mxu0 %v752_v0  ;;  %471 = vmatprep.mubr.msk.f32.mxu0 %vm753_vm0, %v754_v1  ;;  %v82_v3 = vld [vmem:[#allocation5 + $0x8] sm:$0xff]  ;;  %v83_v4 = vld [vmem:[#allocation5 + $0x10] sm:$0xff]  ;;  %v84_v6 = vld [vmem:[#allocation5 + $0x18] sm:$0xff]  ;;  %s755_s28 = smov [#allocation10]  }
  0x4b   :  { %568 = vmatprep.subr.bf16.mxu1 %v752_v0  ;;  %506 = vmatprep.mubr.msk.f32.mxu1 %vm753_vm0, %v754_v1  ;;  %v545_v5 = vpack.c.bf16 %v82_v3, %v81_v2  ;;  %v548_v7 = vpack.c.bf16 %v84_v6, %v83_v4  ;;  %v85_v8 = vld [vmem:[#allocation5 + $0x20] sm:$0xff]  ;;  %v86_v9 = vld [vmem:[#allocation5 + $0x28] sm:$0xff]  ;;  %v179_v12 = vld [vmem:[#allocation7 + $0x10] sm:$0xff]  ;;  %s374_s29 = sshll.u32 %s755_s28, 4  ;;  %s375_s29 = int_to_ptr.vmem [resolvable:$true] %s374_s29 }
  0x4c   :  { %v177_v10 = vld [vmem:[#allocation7] sm:$0xff]  ;;  %v178_v11 = vld [vmem:[#allocation7 + $0x8] sm:$0xff]  ;;  %v180_v13 = vld [vmem:[#allocation7 + $0x18] sm:$0xff]  ;;  %v551_v14 = vpack.c.bf16 %v86_v9, %v85_v8  ;;  %p721_p5 = scmp.lt.s32.totalorder %s375_s29, %s375_s29 }
  0x4d   :  { %546 = vmatpush3.bf16.msra.mxu0 %v545_v5  ;;  %v569_v15 = vpack.c.bf16 %v178_v11, %v177_v10  ;;  %v87_v16 = vld [vmem:[#allocation5 + $0x30] sm:$0xff]  ;;  %v88_v17 = vld [vmem:[#allocation5 + $0x38] sm:$0xff]  ;;  %v572_v18 = vpack.c.bf16 %v180_v13, %v179_v12  ;;  %v181_v19 = vld [vmem:[#allocation7 + $0x20] sm:$0xff] }
  0x4e   :  { %547 = vmatprep.subr.bf16.mxu0 %v752_v0  ;;  %v182_v20 = vld [vmem:[#allocation7 + $0x28] sm:$0xff]  ;;  %v554_v21 = vpack.c.bf16 %v88_v17, %v87_v16  ;;  %v89_v22 = vld [vmem:[#allocation5 + $0x40] sm:$0xff]  ;;  %v183_v25 = vld [vmem:[#allocation7 + $0x30] sm:$0xff] }
  0x4f   :  { %570 = vmatpush3.bf16.msra.mxu1 %v569_v15  ;;  %v90_v23 = vld [vmem:[#allocation5 + $0x48] sm:$0xff]  ;;  %v575_v24 = vpack.c.bf16 %v182_v20, %v181_v19  ;;  %v184_v26 = vld [vmem:[#allocation7 + $0x38] sm:$0xff]  ;;  %v91_v28 = vld [vmem:[#allocation5 + $0x50] sm:$0xff] }
  0x50   :  { %571 = vmatprep.subr.bf16.mxu1 %v752_v0  ;;  %v557_v27 = vpack.c.bf16 %v90_v23, %v89_v22  ;;  %v92_v29 = vld [vmem:[#allocation5 + $0x58] sm:$0xff]  ;;  %v578_v30 = vpack.c.bf16 %v184_v26, %v183_v25  ;;  %v185_v31 = vld [vmem:[#allocation7 + $0x40] sm:$0xff]  ;;  %v186_v32 = vld [vmem:[#allocation7 + $0x48] sm:$0xff] }
  0x51   :  { %549 = vmatpush3.bf16.msra.mxu0 %v548_v7  ;;  %v560_v33 = vpack.c.bf16 %v92_v29, %v91_v28  ;;  %v93_v34 = vld [vmem:[#allocation5 + $0x60] sm:$0xff]  ;;  %v94_v35 = vld [vmem:[#allocation5 + $0x68] sm:$0xff]  ;;  %v581_v36 = vpack.c.bf16 %v186_v32, %v185_v31  ;;  %v187_v37 = vld [vmem:[#allocation7 + $0x50] sm:$0xff] }
  0x52   :  { %550 = vmatprep.subr.bf16.mxu0 %v752_v0  ;;  %v188_v38 = vld [vmem:[#allocation7 + $0x58] sm:$0xff]  ;;  %v563_v39 = vpack.c.bf16 %v94_v35, %v93_v34  ;;  %v95_v40 = vld [vmem:[#allocation5 + $0x70] sm:$0xff]  ;;  %v189_v43 = vld [vmem:[#allocation7 + $0x60] sm:$0xff] }
  0x53   :  { %573 = vmatpush3.bf16.msra.mxu1 %v572_v18  ;;  %v96_v41 = vld [vmem:[#allocation5 + $0x78] sm:$0xff]  ;;  %v584_v42 = vpack.c.bf16 %v188_v38, %v187_v37  ;;  %v190_v44 = vld [vmem:[#allocation7 + $0x68] sm:$0xff]  ;;  %v191_v48 = vld [vmem:[#allocation7 + $0x70] sm:$0xff] }
  0x54   :  { %574 = vmatprep.subr.bf16.mxu1 %v752_v0  ;;  %v566_v45 = vpack.c.bf16 %v96_v41, %v95_v40  ;;  %v587_v46 = vpack.c.bf16 %v190_v44, %v189_v43  ;;  %v80_v47 = vld [vmem:[#allocation2] sm:$0xff]  ;;  %v273_v51 = vld [vmem:[#allocation8] sm:$0xff]  ;;  %v274_v52 = vld [vmem:[#allocation8 + $0x8] sm:$0xff] }
  0x55   :  { %552 = vmatpush3.bf16.msra.mxu0 %v551_v14  ;;  %v192_v49 = vld [vmem:[#allocation7 + $0x78] sm:$0xff]  ;;  %v275_v53 = vld [vmem:[#allocation8 + $0x10] sm:$0xff]  ;;  %v593_v54 = vpack.c.bf16 %v274_v52, %v273_v51  ;;  %v277_v57 = vld [vmem:[#allocation8 + $0x20] sm:$0xff] }
  0x56   :  { %553 = vmatprep.subr.bf16.mxu0 %v752_v0  ;;  %v590_v50 = vpack.c.bf16 %v192_v49, %v191_v48  ;;  %v276_v55 = vld [vmem:[#allocation8 + $0x18] sm:$0xff]  ;;  %v278_v58 = vld [vmem:[#allocation8 + $0x28] sm:$0xff]  ;;  %v279_v60 = vld [vmem:[#allocation8 + $0x30] sm:$0xff] }
  0x57   :  { %576 = vmatpush3.bf16.msra.mxu1 %v575_v24  ;;  %v596_v56 = vpack.c.bf16 %v276_v55, %v275_v53  ;;  %v599_v59 = vpack.c.bf16 %v278_v58, %v277_v57  ;;  %v280_v61 = vld [vmem:[#allocation8 + $0x38] sm:$0xff]  ;;  %v281_v63 = vld [vmem:[#allocation8 + $0x40] sm:$0xff]  ;;  %v283_v3 = vld [vmem:[#allocation8 + $0x50] sm:$0xff] }
  0x58   :  { %577 = vmatprep.subr.bf16.mxu1 %v752_v0  ;;  %v602_v62 = vpack.c.bf16 %v280_v61, %v279_v60  ;;  %v284_v4 = vld [vmem:[#allocation8 + $0x58] sm:$0xff]  ;;  %v285_v6 = vld [vmem:[#allocation8 + $0x60] sm:$0xff]  ;;  %v286_v7 = vld [vmem:[#allocation8 + $0x68] sm:$0xff] }
  0x59   :  { %555 = vmatpush3.bf16.msra.mxu0 %v554_v21  ;;  %v608_v5 = vpack.c.bf16 %v284_v4, %v283_v3  ;;  %v611_v8 = vpack.c.bf16 %v286_v7, %v285_v6  ;;  %v385_v9 = vld [vmem:[%s906_s2] ss:$0 sm:$0xff]  ;;  %v287_v15 = vld [vmem:[#allocation8 + $0x70] sm:$0xff] }
  0x5a   :  { %556 = vmatprep.subr.bf16.mxu0 %v752_v0  ;;  %v288_v16 = vld [vmem:[#allocation8 + $0x78] sm:$0xff] }
  0x5b   :  { %579 = vmatpush3.bf16.msra.mxu1 %v578_v30  ;;  %v614_v17 = vpack.c.bf16 %v288_v16, %v287_v15  ;;  %v386_v18 = vld [vmem:[%s908_s4] ss:$0 sm:$0xff]  ;;  %s716_s4 = scalar_lea.vmem %s375_s29, 128 }
  0x5c   :  { %580 = vmatprep.subr.bf16.mxu1 %v752_v0  ;;  %v387_v23 = vld [vmem:[%s910_s6] ss:$0 sm:$0xff]  ;;  %p717_p4 = scmp.ne.s32.totalorder %s375_s29, %s716_s4  ;;  %p722_p6 = scmp.lt.s32.totalorder %s716_s4, %s716_s4 }
  0x5d   :  { %558 = vmatpush3.bf16.msra.mxu0 %v557_v27 }
  0x5e   :  { %559 = vmatprep.subr.bf16.mxu0 %v752_v0  ;;  %p723_p7 = por %p722_p6, %p721_p5 }
  0x5f   :  { %582 = vmatpush3.bf16.msra.mxu1 %v581_v36 }
  0x60   :  { %583 = vmatprep.subr.bf16.mxu1 %v752_v0  ;;  %p724_p8 = pnand %p723_p7, %p717_p4 }
  0x61   :  { %561 = vmatpush3.bf16.msra.mxu0 %v560_v33 }
  0x62   :  { %562 = vmatprep.subr.bf16.mxu0 %v752_v0 }
  0x63   :  { %585 = vmatpush3.bf16.msra.mxu1 %v584_v42 }
  0x64   :  { %586 = vmatprep.subr.bf16.mxu1 %v752_v0 }
  0x65   :  { %564 = vmatpush3.bf16.msra.mxu0 %v563_v39 }
  0x66   :  { %565 = vmatprep.subr.bf16.mxu0 %v752_v0 }
  0x67   :  { %588 = vmatpush3.bf16.msra.mxu1 %v587_v46 }
  0x68   :  { %589 = vmatprep.subr.bf16.mxu1 %v752_v0 }
  0x69   :  { %567 = vmatpush3.bf16.msra.mxu0 %v566_v45 }
  0x6a   :  { %592 = vmatprep.subr.bf16.mxu0 %v752_v0 }
  0x6b   :  { %591 = vmatpush3.bf16.msra.mxu1 %v590_v50 }
  0x6c   :  { %472 = vmatmul.mubr.f32.vlgmr.msra.gmra.mrb[0].mxu0 %v80_v47 }
  0x6d   :  { %541 = vmatprep.mubr.msk.f32.mxu0 %vm753_vm0, %v754_v1  ;;  %594 = vmatpush3.bf16.msra.mxu0 %v593_v54  ;;  %v282_v1 = vld [vmem:[#allocation8 + $0x48] sm:$0xff] }
  0x6e   :  { %595 = vmatprep.subr.bf16.mxu0 %v752_v0  ;;  %v605_v2 = vpack.c.bf16 %v282_v1, %v281_v63 }
  0x71   :  { %597 = vmatpush3.bf16.msra.mxu0 %v596_v56 }
  0x72   :  { %598 = vmatprep.subr.bf16.mxu0 %v752_v0 }
  0x75   :  { %600 = vmatpush3.bf16.msra.mxu0 %v599_v59 }
  0x76   :  { %601 = vmatprep.subr.bf16.mxu0 %v752_v0 }
  0x79   :  { %603 = vmatpush3.bf16.msra.mxu0 %v602_v62 }
  0x7a   :  { %604 = vmatprep.subr.bf16.mxu0 %v752_v0 }
  0x7d   :  { %606 = vmatpush3.bf16.msra.mxu0 %v605_v2 }
  0x7e   :  { %607 = vmatprep.subr.bf16.mxu0 %v752_v0 }
  0x81   :  { %609 = vmatpush3.bf16.msra.mxu0 %v608_v5 }
  0x82   :  { %610 = vmatprep.subr.bf16.mxu0 %v752_v0 }
  0x85   :  { %612 = vmatpush3.bf16.msra.mxu0 %v611_v8 }
  0x86   :  { %613 = vmatprep.subr.bf16.mxu0 %v752_v0 }
  0x89   :  { %615 = vmatpush3.bf16.msra.mxu0 %v614_v17 }
 0x13f   :  { %v170_v10 = vpop.f32.mrb[0].mxu0 }
 0x140   :  { %v171_v11 = vadd.f32 %v385_v9, %v170_v10  ;;  %v473_v12 = vpop.f32.mrb[1].mxu0 }
 0x142   :  { %v175_v13 = vmul.f32 0.01, %v171_v11  ;;  %vm174_vm1 = vcmp.gt.f32.partialorder %v171_v11, 0.0 }
 0x144   :  { %v176_v14 = vsel %vm174_vm1, %v171_v11, %v175_v13 }
 0x145   :  { %507 = vmatmul.mubr.f32.vlgmr.msra.gmra.mrb[0].mxu1 %v176_v14 }
 0x218   :  { %v266_v0 = vpop.f32.mrb[0].mxu1 }
 0x219   :  { %v267_v19 = vadd.f32 %v386_v18, %v266_v0  ;;  %v508_v20 = vpop.f32.mrb[1].mxu1 }
 0x21b   :  { %vm270_vm2 = vcmp.gt.f32.partialorder %v267_v19, 0.0  ;;  %v271_v21 = vmul.f32 0.01, %v267_v19 }
 0x21d   :  { %v272_v22 = vsel %vm270_vm2, %v267_v19, %v271_v21 }
 0x21e   :  { %542 = vmatmul.mubr.f32.vlgmr.msra.gmra.mrb[2].mxu0 %v272_v22 }
 0x2f1   :  { %v362_v24 = vpop.f32.mrb[2].mxu0 }
 0x2f2   :  { %v363_v25 = vadd.f32 %v387_v23, %v362_v24  ;;  %v543_v26 = vpop.f32.mrb[3].mxu0 }
 0x2f4   :  { %626 = vtanh.f32 %v363_v25 }
 0x2fe   :  { %v627_v27 = vpop.eup %626 }
 0x2ff   :  { %367 = vst [vmem:[#allocation10] sm:$0xff] %v627_v27 }
 0x300   :  { %727 = shalt.err (!%p724_p8)
}
 0x301   :  { %s728_s6 = scalar_lea.hbm %s911_s7, 128 }
 0x302   :  { %p729_p9 = scmp.ne.s32.totalorder %s911_s7, %s728_s6  ;;  %p732_p10 = scmp.lt.u32.totalorder %s728_s6, %s911_s7 }
 0x304   :  { %p734_p11 = pnand %p732_p10, %p729_p9 }
 0x306   :  { %737 = shalt.err (!%p734_p11)
}
 0x307   :  { %377 = dma.vmem_to_hbm [thread:$0]  %s375_s29, 128, %s911_s7, [#allocation4]  }
 0x308   :  { %744 = dma.done.wait [#allocation4], 128  }
 0x309   :  { %745 = vsyncadd [#allocation4], 4294967168 }
 0x30a   :  { %381 = vsyncpa [#allocation3], 1 }
 0x30b   :  { %382 = vsyncpa [#allocation6], 1 }
 0x30c   :  { %383 = vsyncpa [#allocation9], 1 }
 0x30d   :  { %384 = vsyncpa [#allocation4], 1 }

// kernel: tpu_custom_call.1
= control target key start
LH: loop header
LB: loop body
LE: loop exit
PB: predicated region body
PF: predicated region fallthrough
CT: control target
= control target key end

     0   :  { %12 = vsyncpa [#allocation3], 0  ;;  %s904_s0 = inlined_call_operand.hbm [shape: f32[8,128], index: 0, kind: input, shape index: {}]   ;;  %s905_s1 = inlined_call_operand.hbm [shape: f32[128,128], index: 1, kind: input, shape index: {}]   ;;  %s906_s2 = inlined_call_operand.vmem [shape: f32[1,128], index: 2, kind: input, shape index: {}]   ;;  %s907_s3 = inlined_call_operand.hbm [shape: f32[128,128], index: 3, kind: input, shape index: {}]   ;;  %s908_s4 = inlined_call_operand.vmem [shape: f32[1,128], index: 4, kind: input, shape index: {}]   ;;  %s909_s5 = inlined_call_operand.hbm [shape: f32[128,128], index: 5, kind: input, shape index: {}]   ;;  %s910_s6 = inlined_call_operand.vmem [shape: f32[1,128], index: 6, kind: input, shape index: {}]   ;;  %s911_s7 = inlined_call_operand.hbm [shape: f32[8,128], index: 7, kind: output, shape index: {}]  }
   0x1   :  { %13 = vsyncpa [#allocation6], 0 }
   0x2   :  { %14 = vsyncpa [#allocation9], 0 }
   0x3   :  { %15 = vsyncpa [#allocation4], 0  ;;  %s746_s24 = smov [#allocation5]   ;;  %s628_s28 = scalar_lea.hbm %s905_s1, 2048 }
   0x4   :  { %s31_s25 = sshll.u32 %s746_s24, 4  ;;  %p629_p0 = scmp.ne.s32.totalorder %s905_s1, %s628_s28  ;;  %s32_s25 = int_to_ptr.vmem [resolvable:$true] %s31_s25 }
   0x5   :  { %p632_p1 = scmp.lt.u32.totalorder %s628_s28, %s905_s1 }
   0x7   :  { %p634_p2 = pnand %p632_p1, %p629_p0 }
   0x9   :  { %637 = shalt.err (!%p634_p2)
}
   0xa   :  { %s638_s10 = scalar_lea.vmem %s32_s25, 2048  ;;  %p643_p4 = scmp.lt.s32.totalorder %s32_s25, %s32_s25 }
   0xb   :  { %p639_p3 = scmp.ne.s32.totalorder %s32_s25, %s638_s10  ;;  %p644_p5 = scmp.lt.s32.totalorder %s638_s10, %s638_s10 }
   0xd   :  { %p645_p6 = por %p644_p5, %p643_p4 }
   0xf   :  { %p646_p7 = pnand %p645_p6, %p639_p3 }
  0x11   :  { %649 = shalt.err (!%p646_p7)
}
  0x12   :  { %s747_s11 = smov 128   ;;  %s748_s12 = smov 8  }
  0x13   :  { %37 = dma.hbm_to_vmem [thread:$0]  %s905_s1, 2048, %s32_s25, [#allocation6], %s747_s11, %s747_s11, %s748_s12  }
  0x14   :  { %s749_s15 = smov [#allocation2]   ;;  %s750_s17 = smov [#allocation7]  }
  0x15   :  { %s22_s16 = sshll.u32 %s749_s15, 4  ;;  %s45_s18 = sshll.u32 %s750_s17, 4  ;;  %s23_s16 = int_to_ptr.vmem [resolvable:$true] %s22_s16  ;;  %s46_s18 = int_to_ptr.vmem [resolvable:$true] %s45_s18 }
  0x16   :  { %s650_s21 = scalar_lea.hbm %s904_s0, 128 }
  0x17   :  { %p651_p8 = scmp.ne.s32.totalorder %s904_s0, %s650_s21  ;;  %p654_p9 = scmp.lt.u32.totalorder %s650_s21, %s904_s0 }
  0x19   :  { %p656_p10 = pnand %p654_p9, %p651_p8 }
  0x1b   :  { %659 = shalt.err (!%p656_p10)
}
  0x1c   :  { %s660_s1 = scalar_lea.vmem %s23_s16, 128  ;;  %p665_p12 = scmp.lt.s32.totalorder %s23_s16, %s23_s16 }
  0x1d   :  { %p661_p11 = scmp.ne.s32.totalorder %s23_s16, %s660_s1  ;;  %p666_p13 = scmp.lt.s32.totalorder %s660_s1, %s660_s1 }
  0x1f   :  { %p667_p0 = por %p666_p13, %p665_p12 }
  0x21   :  { %p668_p1 = pnand %p667_p0, %p661_p11 }
  0x23   :  { %671 = shalt.err (!%p668_p1)
}
  0x24   :  { %25 = dma.hbm_to_vmem [thread:$0]  %s904_s0, 128, %s23_s16, [#allocation3]  }
  0x25   :  { %s672_s30 = scalar_lea.hbm %s907_s3, 2048 }
  0x26   :  { %p673_p2 = scmp.ne.s32.totalorder %s907_s3, %s672_s30  ;;  %p676_p3 = scmp.lt.u32.totalorder %s672_s30, %s907_s3 }
  0x28   :  { %p678_p4 = pnand %p676_p3, %p673_p2 }
  0x2a   :  { %681 = shalt.err (!%p678_p4)
}
  0x2b   :  { %s682_s14 = scalar_lea.vmem %s46_s18, 2048  ;;  %p687_p6 = scmp.lt.s32.totalorder %s46_s18, %s46_s18 }
  0x2c   :  { %p683_p5 = scmp.ne.s32.totalorder %s46_s18, %s682_s14  ;;  %p688_p7 = scmp.lt.s32.totalorder %s682_s14, %s682_s14 }
  0x2e   :  { %p689_p8 = por %p688_p7, %p687_p6 }
  0x30   :  { %p690_p9 = pnand %p689_p8, %p683_p5 }
  0x32   :  { %693 = shalt.err (!%p690_p9)
}
  0x33   :  { %51 = dma.hbm_to_vmem [thread:$0]  %s907_s3, 2048, %s46_s18, [#allocation6], %s747_s11, %s747_s11, %s748_s12  }
  0x34   :  { %s751_s16 = smov [#allocation8]   ;;  %s694_s21 = scalar_lea.hbm %s909_s5, 2048 }
  0x35   :  { %s59_s17 = sshll.u32 %s751_s16, 4  ;;  %p695_p10 = scmp.ne.s32.totalorder %s909_s5, %s694_s21  ;;  %s60_s17 = int_to_ptr.vmem [resolvable:$true] %s59_s17 }
  0x36   :  { %p698_p11 = scmp.lt.u32.totalorder %s694_s21, %s909_s5 }
  0x38   :  { %p700_p12 = pnand %p698_p11, %p695_p10 }
  0x3a   :  { %703 = shalt.err (!%p700_p12)
}
  0x3b   :  { %s704_s1 = scalar_lea.vmem %s60_s17, 2048  ;;  %p709_p0 = scmp.lt.s32.totalorder %s60_s17, %s60_s17 }
  0x3c   :  { %p705_p13 = scmp.ne.s32.totalorder %s60_s17, %s704_s1  ;;  %p710_p1 = scmp.lt.s32.totalorder %s704_s1, %s704_s1 }
  0x3e   :  { %p711_p2 = por %p710_p1, %p709_p0 }
  0x40   :  { %p712_p3 = pnand %p711_p2, %p705_p13 }
  0x42   :  { %715 = shalt.err (!%p712_p3)
}
  0x43   :  { %65 = dma.hbm_to_vmem [thread:$0]  %s909_s5, 2048, %s60_s17, [#allocation9], %s747_s11, %s747_s11, %s748_s12  }
  0x44   :  { %738 = dma.done.wait [#allocation3], 128  }
  0x45   :  { %739 = vsyncadd [#allocation3], 4294967168 }
  0x46   :  { %740 = dma.done.wait [#allocation6], 4096  }
  0x47   :  { %741 = vsyncadd [#allocation6], 4294963200 }
  0x48   :  { %742 = dma.done.wait [#allocation9], 2048  }
  0x49   :  { %743 = vsyncadd [#allocation9], 4294965248  ;;  %v752_v0 = vmov 0.0|0.0   ;;  %vm753_vm0 = vmmov 0   ;;  %v754_v1 = vmov 0.0   ;;  %v81_v2 = vld [vmem:[#allocation5] sm:$0xff] }
  0x4a   :  { %544 = vmatprep.subr.bf16.mxu0 %v752_v0  ;;  %471 = vmatprep.mubr.msk.f32.mxu0 %vm753_vm0, %v754_v1  ;;  %v82_v3 = vld [vmem:[#allocation5 + $0x8] sm:$0xff]  ;;  %v83_v4 = vld [vmem:[#allocation5 + $0x10] sm:$0xff]  ;;  %v84_v6 = vld [vmem:[#allocation5 + $0x18] sm:$0xff]  ;;  %s755_s28 = smov [#allocation10]  }
  0x4b   :  { %568 = vmatprep.subr.bf16.mxu1 %v752_v0  ;;  %506 = vmatprep.mubr.msk.f32.mxu1 %vm753_vm0, %v754_v1  ;;  %v545_v5 = vpack.c.bf16 %v82_v3, %v81_v2  ;;  %v548_v7 = vpack.c.bf16 %v84_v6, %v83_v4  ;;  %v85_v8 = vld [vmem:[#allocation5 + $0x20] sm:$0xff]  ;;  %v86_v9 = vld [vmem:[#allocation5 + $0x28] sm:$0xff]  ;;  %v179_v12 = vld [vmem:[#allocation7 + $0x10] sm:$0xff]  ;;  %s374_s29 = sshll.u32 %s755_s28, 4  ;;  %s375_s29 = int_to_ptr.vmem [resolvable:$true] %s374_s29 }
  0x4c   :  { %v177_v10 = vld [vmem:[#allocation7] sm:$0xff]  ;;  %v178_v11 = vld [vmem:[#allocation7 + $0x8] sm:$0xff]  ;;  %v180_v13 = vld [vmem:[#allocation7 + $0x18] sm:$0xff]  ;;  %v551_v14 = vpack.c.bf16 %v86_v9, %v85_v8  ;;  %p721_p5 = scmp.lt.s32.totalorder %s375_s29, %s375_s29 }
  0x4d   :  { %546 = vmatpush3.bf16.msra.mxu0 %v545_v5  ;;  %v569_v15 = vpack.c.bf16 %v178_v11, %v177_v10  ;;  %v87_v16 = vld [vmem:[#allocation5 + $0x30] sm:$0xff]  ;;  %v88_v17 = vld [vmem:[#allocation5 + $0x38] sm:$0xff]  ;;  %v572_v18 = vpack.c.bf16 %v180_v13, %v179_v12  ;;  %v181_v19 = vld [vmem:[#allocation7 + $0x20] sm:$0xff] }
  0x4e   :  { %547 = vmatprep.subr.bf16.mxu0 %v752_v0  ;;  %v182_v20 = vld [vmem:[#allocation7 + $0x28] sm:$0xff]  ;;  %v554_v21 = vpack.c.bf16 %v88_v17, %v87_v16  ;;  %v89_v22 = vld [vmem:[#allocation5 + $0x40] sm:$0xff]  ;;  %v183_v25 = vld [vmem:[#allocation7 + $0x30] sm:$0xff] }
  0x4f   :  { %570 = vmatpush3.bf16.msra.mxu1 %v569_v15  ;;  %v90_v23 = vld [vmem:[#allocation5 + $0x48] sm:$0xff]  ;;  %v575_v24 = vpack.c.bf16 %v182_v20, %v181_v19  ;;  %v184_v26 = vld [vmem:[#allocation7 + $0x38] sm:$0xff]  ;;  %v91_v28 = vld [vmem:[#allocation5 + $0x50] sm:$0xff] }
  0x50   :  { %571 = vmatprep.subr.bf16.mxu1 %v752_v0  ;;  %v557_v27 = vpack.c.bf16 %v90_v23, %v89_v22  ;;  %v92_v29 = vld [vmem:[#allocation5 + $0x58] sm:$0xff]  ;;  %v578_v30 = vpack.c.bf16 %v184_v26, %v183_v25  ;;  %v185_v31 = vld [vmem:[#allocation7 + $0x40] sm:$0xff]  ;;  %v186_v32 = vld [vmem:[#allocation7 + $0x48] sm:$0xff] }
  0x51   :  { %549 = vmatpush3.bf16.msra.mxu0 %v548_v7  ;;  %v560_v33 = vpack.c.bf16 %v92_v29, %v91_v28  ;;  %v93_v34 = vld [vmem:[#allocation5 + $0x60] sm:$0xff]  ;;  %v94_v35 = vld [vmem:[#allocation5 + $0x68] sm:$0xff]  ;;  %v581_v36 = vpack.c.bf16 %v186_v32, %v185_v31  ;;  %v187_v37 = vld [vmem:[#allocation7 + $0x50] sm:$0xff] }
  0x52   :  { %550 = vmatprep.subr.bf16.mxu0 %v752_v0  ;;  %v188_v38 = vld [vmem:[#allocation7 + $0x58] sm:$0xff]  ;;  %v563_v39 = vpack.c.bf16 %v94_v35, %v93_v34  ;;  %v95_v40 = vld [vmem:[#allocation5 + $0x70] sm:$0xff]  ;;  %v189_v43 = vld [vmem:[#allocation7 + $0x60] sm:$0xff] }
  0x53   :  { %573 = vmatpush3.bf16.msra.mxu1 %v572_v18  ;;  %v96_v41 = vld [vmem:[#allocation5 + $0x78] sm:$0xff]  ;;  %v584_v42 = vpack.c.bf16 %v188_v38, %v187_v37  ;;  %v190_v44 = vld [vmem:[#allocation7 + $0x68] sm:$0xff]  ;;  %v191_v48 = vld [vmem:[#allocation7 + $0x70] sm:$0xff] }
  0x54   :  { %574 = vmatprep.subr.bf16.mxu1 %v752_v0  ;;  %v566_v45 = vpack.c.bf16 %v96_v41, %v95_v40  ;;  %v587_v46 = vpack.c.bf16 %v190_v44, %v189_v43  ;;  %v80_v47 = vld [vmem:[#allocation2] sm:$0xff]  ;;  %v273_v51 = vld [vmem:[#allocation8] sm:$0xff]  ;;  %v274_v52 = vld [vmem:[#allocation8 + $0x8] sm:$0xff] }
  0x55   :  { %552 = vmatpush3.bf16.msra.mxu0 %v551_v14  ;;  %v192_v49 = vld [vmem:[#allocation7 + $0x78] sm:$0xff]  ;;  %v275_v53 = vld [vmem:[#allocation8 + $0x10] sm:$0xff]  ;;  %v593_v54 = vpack.c.bf16 %v274_v52, %v273_v51  ;;  %v277_v57 = vld [vmem:[#allocation8 + $0x20] sm:$0xff] }
  0x56   :  { %553 = vmatprep.subr.bf16.mxu0 %v752_v0  ;;  %v590_v50 = vpack.c.bf16 %v192_v49, %v191_v48  ;;  %v276_v55 = vld [vmem:[#allocation8 + $0x18] sm:$0xff]  ;;  %v278_v58 = vld [vmem:[#allocation8 + $0x28] sm:$0xff]  ;;  %v279_v60 = vld [vmem:[#allocation8 + $0x30] sm:$0xff] }
  0x57   :  { %576 = vmatpush3.bf16.msra.mxu1 %v575_v24  ;;  %v596_v56 = vpack.c.bf16 %v276_v55, %v275_v53  ;;  %v599_v59 = vpack.c.bf16 %v278_v58, %v277_v57  ;;  %v280_v61 = vld [vmem:[#allocation8 + $0x38] sm:$0xff]  ;;  %v281_v63 = vld [vmem:[#allocation8 + $0x40] sm:$0xff]  ;;  %v283_v3 = vld [vmem:[#allocation8 + $0x50] sm:$0xff] }
  0x58   :  { %577 = vmatprep.subr.bf16.mxu1 %v752_v0  ;;  %v602_v62 = vpack.c.bf16 %v280_v61, %v279_v60  ;;  %v284_v4 = vld [vmem:[#allocation8 + $0x58] sm:$0xff]  ;;  %v285_v6 = vld [vmem:[#allocation8 + $0x60] sm:$0xff]  ;;  %v286_v7 = vld [vmem:[#allocation8 + $0x68] sm:$0xff] }
  0x59   :  { %555 = vmatpush3.bf16.msra.mxu0 %v554_v21  ;;  %v608_v5 = vpack.c.bf16 %v284_v4, %v283_v3  ;;  %v611_v8 = vpack.c.bf16 %v286_v7, %v285_v6  ;;  %v385_v9 = vld [vmem:[%s906_s2] ss:$0 sm:$0xff]  ;;  %v287_v15 = vld [vmem:[#allocation8 + $0x70] sm:$0xff] }
  0x5a   :  { %556 = vmatprep.subr.bf16.mxu0 %v752_v0  ;;  %v288_v16 = vld [vmem:[#allocation8 + $0x78] sm:$0xff] }
  0x5b   :  { %579 = vmatpush3.bf16.msra.mxu1 %v578_v30  ;;  %v614_v17 = vpack.c.bf16 %v288_v16, %v287_v15  ;;  %v386_v18 = vld [vmem:[%s908_s4] ss:$0 sm:$0xff]  ;;  %s716_s4 = scalar_lea.vmem %s375_s29, 128 }
  0x5c   :  { %580 = vmatprep.subr.bf16.mxu1 %v752_v0  ;;  %v387_v23 = vld [vmem:[%s910_s6] ss:$0 sm:$0xff]  ;;  %p717_p4 = scmp.ne.s32.totalorder %s375_s29, %s716_s4  ;;  %p722_p6 = scmp.lt.s32.totalorder %s716_s4, %s716_s4 }
  0x5d   :  { %558 = vmatpush3.bf16.msra.mxu0 %v557_v27 }
  0x5e   :  { %559 = vmatprep.subr.bf16.mxu0 %v752_v0  ;;  %p723_p7 = por %p722_p6, %p721_p5 }
  0x5f   :  { %582 = vmatpush3.bf16.msra.mxu1 %v581_v36 }
  0x60   :  { %583 = vmatprep.subr.bf16.mxu1 %v752_v0  ;;  %p724_p8 = pnand %p723_p7, %p717_p4 }
  0x61   :  { %561 = vmatpush3.bf16.msra.mxu0 %v560_v33 }
  0x62   :  { %562 = vmatprep.subr.bf16.mxu0 %v752_v0 }
  0x63   :  { %585 = vmatpush3.bf16.msra.mxu1 %v584_v42 }
  0x64   :  { %586 = vmatprep.subr.bf16.mxu1 %v752_v0 }
  0x65   :  { %564 = vmatpush3.bf16.msra.mxu0 %v563_v39 }
  0x66   :  { %565 = vmatprep.subr.bf16.mxu0 %v752_v0 }
  0x67   :  { %588 = vmatpush3.bf16.msra.mxu1 %v587_v46 }
  0x68   :  { %589 = vmatprep.subr.bf16.mxu1 %v752_v0 }
  0x69   :  { %567 = vmatpush3.bf16.msra.mxu0 %v566_v45 }
  0x6a   :  { %592 = vmatprep.subr.bf16.mxu0 %v752_v0 }
  0x6b   :  { %591 = vmatpush3.bf16.msra.mxu1 %v590_v50 }
  0x6c   :  { %472 = vmatmul.mubr.f32.vlgmr.msra.gmra.mrb[0].mxu0 %v80_v47 }
  0x6d   :  { %541 = vmatprep.mubr.msk.f32.mxu0 %vm753_vm0, %v754_v1  ;;  %594 = vmatpush3.bf16.msra.mxu0 %v593_v54  ;;  %v282_v1 = vld [vmem:[#allocation8 + $0x48] sm:$0xff] }
  0x6e   :  { %595 = vmatprep.subr.bf16.mxu0 %v752_v0  ;;  %v605_v2 = vpack.c.bf16 %v282_v1, %v281_v63 }
  0x71   :  { %597 = vmatpush3.bf16.msra.mxu0 %v596_v56 }
  0x72   :  { %598 = vmatprep.subr.bf16.mxu0 %v752_v0 }
  0x75   :  { %600 = vmatpush3.bf16.msra.mxu0 %v599_v59 }
  0x76   :  { %601 = vmatprep.subr.bf16.mxu0 %v752_v0 }
  0x79   :  { %603 = vmatpush3.bf16.msra.mxu0 %v602_v62 }
  0x7a   :  { %604 = vmatprep.subr.bf16.mxu0 %v752_v0 }
  0x7d   :  { %606 = vmatpush3.bf16.msra.mxu0 %v605_v2 }
  0x7e   :  { %607 = vmatprep.subr.bf16.mxu0 %v752_v0 }
  0x81   :  { %609 = vmatpush3.bf16.msra.mxu0 %v608_v5 }
  0x82   :  { %610 = vmatprep.subr.bf16.mxu0 %v752_v0 }
  0x85   :  { %612 = vmatpush3.bf16.msra.mxu0 %v611_v8 }
  0x86   :  { %613 = vmatprep.subr.bf16.mxu0 %v752_v0 }
  0x89   :  { %615 = vmatpush3.bf16.msra.mxu0 %v614_v17 }
 0x13f   :  { %v170_v10 = vpop.f32.mrb[0].mxu0 }
 0x140   :  { %v171_v11 = vadd.f32 %v385_v9, %v170_v10  ;;  %v473_v12 = vpop.f32.mrb[1].mxu0 }
 0x142   :  { %v175_v13 = vmul.f32 0.01, %v171_v11  ;;  %vm174_vm1 = vcmp.gt.f32.partialorder %v171_v11, 0.0 }
 0x144   :  { %v176_v14 = vsel %vm174_vm1, %v171_v11, %v175_v13 }
 0x145   :  { %507 = vmatmul.mubr.f32.vlgmr.msra.gmra.mrb[0].mxu1 %v176_v14 }
 0x218   :  { %v266_v0 = vpop.f32.mrb[0].mxu1 }
 0x219   :  { %v267_v19 = vadd.f32 %v386_v18, %v266_v0  ;;  %v508_v20 = vpop.f32.mrb[1].mxu1 }
 0x21b   :  { %vm270_vm2 = vcmp.gt.f32.partialorder %v267_v19, 0.0  ;;  %v271_v21 = vmul.f32 0.01, %v267_v19 }
 0x21d   :  { %v272_v22 = vsel %vm270_vm2, %v267_v19, %v271_v21 }
 0x21e   :  { %542 = vmatmul.mubr.f32.vlgmr.msra.gmra.mrb[2].mxu0 %v272_v22 }
 0x2f1   :  { %v362_v24 = vpop.f32.mrb[2].mxu0 }
 0x2f2   :  { %v363_v25 = vadd.f32 %v387_v23, %v362_v24  ;;  %v543_v26 = vpop.f32.mrb[3].mxu0 }
 0x2f4   :  { %626 = vtanh.f32 %v363_v25 }
 0x2fe   :  { %v627_v27 = vpop.eup %626 }
 0x2ff   :  { %367 = vst [vmem:[#allocation10] sm:$0xff] %v627_v27 }
 0x300   :  { %727 = shalt.err (!%p724_p8)
}
 0x301   :  { %s728_s6 = scalar_lea.hbm %s911_s7, 128 }
 0x302   :  { %p729_p9 = scmp.ne.s32.totalorder %s911_s7, %s728_s6  ;;  %p732_p10 = scmp.lt.u32.totalorder %s728_s6, %s911_s7 }
 0x304   :  { %p734_p11 = pnand %p732_p10, %p729_p9 }
 0x306   :  { %737 = shalt.err (!%p734_p11)
}
 0x307   :  { %377 = dma.vmem_to_hbm [thread:$0]  %s375_s29, 128, %s911_s7, [#allocation4]  }
 0x308   :  { %744 = dma.done.wait [#allocation4], 128  }
 0x309   :  { %745 = vsyncadd [#allocation4], 4294967168 }
 0x30a   :  { %381 = vsyncpa [#allocation3], 1 }
 0x30b   :  { %382 = vsyncpa [#allocation6], 1 }
 0x30c   :  { %383 = vsyncpa [#allocation9], 1 }
 0x30d   :  { %384 = vsyncpa [#allocation4], 1 }

</bundles_post_ra>
